<compile_context>
chip_gen: v6e
topology: v6e:2x2x1
jax: 0.10.0
libtpu: 0.0.40
codegen_flags: <defaults>
</compile_context>

<pallas_src>
import jax
import jax.numpy as jnp
from jax.experimental import pallas as pl
from jax.experimental.pallas import tpu as pltpu


def _normalize_kernel(x_ref, scale_ref, bias_ref, o_ref):
    # x_ref: (TR, TC); scale_ref/bias_ref: (TR, 1) f32, broadcast over columns.
    # Math stays in f32 on every generation (v5e has no bf16 VALU/EUP); the
    # kernel is HBM-bound so the widen costs ~nothing in wall time.
    x = x_ref[...].astype(jnp.float32)
    o_ref[...] = (x * scale_ref[...] + bias_ref[...]).astype(o_ref.dtype)


def _tpu_budgets():
    """Generation-aware (target_block_bytes, vmem_limit_bytes)."""
    # Defaults: v6e-class (128 MiB VMEM, fast HBM).
    target, limit = 8 * 1024 * 1024, 64 * 1024 * 1024
    kind = ""
    try:
        kind = jax.devices()[0].device_kind.lower()
    except Exception:  # pragma: no cover - CPU/interpret fallback
        pass
    vmem_cap = None
    try:
        vmem_cap = pltpu.get_tpu_info().vmem_capacity_bytes
    except Exception:  # pragma: no cover - non-TPU or older runtime
        vmem_cap = None

    if ("v5e" in kind) or ("v5 lite" in kind) or ("v5litepod" in kind):
        # v5e: ~0.8 TB/s HBM -> per-step overhead already <4% at 4 MiB blocks;
        # bigger blocks just raise VMEM pressure. 32 MiB overrides the 16 MiB
        # scoped default.
        target, limit = 4 * 1024 * 1024, 32 * 1024 * 1024
    elif vmem_cap is not None and vmem_cap <= 64 * 1024 * 1024:
        # v7x-class: only 64 MiB VMEM per TensorCore -> cap scoped limit at
        # 48 MiB while keeping 8 MiB blocks (~4x block double-buffer footprint
        # = 32 MiB, comfortably inside the cap).
        target, limit = 8 * 1024 * 1024, 48 * 1024 * 1024
    return target, limit


def normalize(x_nchw: jax.Array, mean, std, out_dtype=None) -> jax.Array:
    """(x - mean) / std with per-channel mean/std, input in NCHW.

    `out_dtype` optionally narrows the output (e.g. bf16) to cut write traffic
    when the downstream consumer allows it; default preserves the input dtype.
    """
    n, c, h, w = x_nchw.shape
    dtype = x_nchw.dtype
    assert jnp.issubdtype(dtype, jnp.floating), "Normalize is float-only"
    out_dtype = dtype if out_dtype is None else jnp.dtype(out_dtype)
    elem_bytes = jnp.dtype(dtype).itemsize

    rows = n * c
    cols = h * w

    # Pure reshape (contiguous) -> (N*C, H*W) lane-dense slab. No transposes.
    x2d = x_nchw.reshape(rows, cols)

    # Fold (x - mean)/std into x*scale + bias, computed in f32 on length-C arrays.
    mean_f = jnp.broadcast_to(jnp.asarray(mean, jnp.float32), (c,))
    std_f = jnp.broadcast_to(jnp.asarray(std, jnp.float32), (c,))
    scale = 1.0 / std_f
    bias = -mean_f / std_f
    # Row r of x2d corresponds to channel r % C (NCHW flattening), so tiling
    # the length-C params N times gives the per-row parameter columns.
    scale_rows = jnp.tile(scale, n).reshape(rows, 1)
    bias_rows = jnp.tile(bias, n).reshape(rows, 1)

    target_block_bytes, vmem_limit_bytes = _tpu_budgets()

    # --- Tile sizing -------------------------------------------------------
    # Sublane granularity for the second-to-last dim (8 for f32, 16 for bf16).
    sublane = max(8, 32 // elem_bytes)

    # Last dim: tile in 128-lane multiples sized to the block budget; the
    # ragged edge (cols not a multiple of 128) is masked by the pl.cdiv grid,
    # so only the final edge block pays the masked-store path.
    if cols < 128:
        tile_cols = cols  # full-extent block is always legal
    else:
        max_tc = max(128, target_block_bytes // (sublane * elem_bytes))
        tile_cols = min((max_tc // 128) * 128, (cols // 128) * 128)
        tile_cols = max(tile_cols, 128)

    # Second-to-last dim: multiple of the sublane count, or full extent.
    max_tr = max(1, target_block_bytes // (tile_cols * elem_bytes))
    if max_tr >= rows:
        tile_rows = rows  # full-extent block
    else:
        tile_rows = max(sublane, (max_tr // sublane) * sublane)

    grid_rows = pl.cdiv(rows, tile_rows)
    grid_cols = pl.cdiv(cols, tile_cols)

    # Guarantee >=2 grid steps so a v7x megacore (2 TCs) can shard the stream;
    # prefer splitting rows (keeps stores full lane width), else split cols.
    if grid_rows * grid_cols == 1:
        if rows >= 2 * sublane:
            tile_rows = max(sublane, pl.cdiv(pl.cdiv(rows, 2), sublane) * sublane)
            grid_rows = pl.cdiv(rows, tile_rows)
        elif tile_cols >= 256:
            tile_cols = max(128, ((pl.cdiv(cols, 2)) // 128) * 128)
            grid_cols = pl.cdiv(cols, tile_cols)
        # else: tensor is tiny; a single step is fine.

    grid = (grid_rows, grid_cols)

    out2d = pl.pallas_call(
        _normalize_kernel,
        out_shape=jax.ShapeDtypeStruct((rows, cols), out_dtype),
        grid_spec=pltpu.PrefetchScalarGridSpec(
            num_scalar_prefetch=0,
            grid=grid,
            in_specs=[
                pl.BlockSpec((tile_rows, tile_cols), lambda i, j: (i, j)),
                pl.BlockSpec((tile_rows, 1), lambda i, j: (i, 0)),
                pl.BlockSpec((tile_rows, 1), lambda i, j: (i, 0)),
            ],
            out_specs=pl.BlockSpec((tile_rows, tile_cols), lambda i, j: (i, j)),
        ),
        compiler_params=pltpu.CompilerParams(
            dimension_semantics=("parallel", "parallel"),
            vmem_limit_bytes=vmem_limit_bytes,
        ),
    )(x2d, scale_rows, bias_rows)

    return out2d.reshape(n, c, h, w)


if __name__ == "__main__":
    key = jax.random.PRNGKey(0)
    kx, km, ks = jax.random.split(key, 3)

    N, C, H, W = 2, 4, 16, 16
    x = jax.random.normal(kx, (N, C, H, W), dtype=jnp.float32)

    # Deterministic per-channel mean/std parameters (std kept positive).
    mean = jax.random.normal(km, (C,), dtype=jnp.float32) * 0.5
    std = jax.random.uniform(ks, (C,), dtype=jnp.float32,
                             minval=0.5, maxval=1.5)

    out = normalize(x, mean, std)
    out = jax.block_until_ready(out)

    # Reference check against plain JAX broadcasting of (x - mean) / std.
    ref = (x - mean.reshape(1, C, 1, 1)) / std.reshape(1, C, 1, 1)
    assert out.shape == x.shape and out.dtype == x.dtype
    assert jnp.allclose(out, ref, atol=1e-5, rtol=1e-5)

    print("KERNEL_OK")
</pallas_src>

<mosaic_0001>
module attributes {stable_mosaic.version = 11 : i64} {
  func.func @_normalize_kernel(%arg0: i32, %arg1: i32, %arg2: memref<8x128xf32, #tpu.memory_space<vmem>>, %arg3: memref<8x1xf32, #tpu.memory_space<vmem>>, %arg4: memref<8x1xf32, #tpu.memory_space<vmem>>, %arg5: memref<8x128xf32, #tpu.memory_space<vmem>>) attributes {dimension_semantics = [#tpu.dimension_semantics<parallel>, #tpu.dimension_semantics<parallel>], iteration_bounds = array<i64: 1, 2>, scalar_prefetch = 0 : i64, scratch_operands = 0 : i64, tpu.core_type = #tpu.core_type<tc>, window_params = [{transform_indices = @transform_0, window_bounds = array<i64: 8, 128>}, {transform_indices = @transform_1, window_bounds = array<i64: 8, 1>}, {transform_indices = @transform_2, window_bounds = array<i64: 8, 1>}, {transform_indices = @transform_3, window_bounds = array<i64: 8, 128>}]} {
    %c0 = arith.constant 0 : index
    %c0_0 = arith.constant 0 : index
    %0 = vector.load %arg2[%c0, %c0_0] : memref<8x128xf32, #tpu.memory_space<vmem>>, vector<8x128xf32>
    %c0_1 = arith.constant 0 : index
    %c0_2 = arith.constant 0 : index
    %1 = vector.load %arg3[%c0_1, %c0_2] : memref<8x1xf32, #tpu.memory_space<vmem>>, vector<8x1xf32>
    %2 = vector.broadcast %1 : vector<8x1xf32> to vector<8x128xf32>
    %3 = arith.mulf %0, %2 : vector<8x128xf32>
    %c0_3 = arith.constant 0 : index
    %c0_4 = arith.constant 0 : index
    %4 = vector.load %arg4[%c0_3, %c0_4] : memref<8x1xf32, #tpu.memory_space<vmem>>, vector<8x1xf32>
    %5 = vector.broadcast %4 : vector<8x1xf32> to vector<8x128xf32>
    %6 = arith.addf %3, %5 : vector<8x128xf32>
    %c0_5 = arith.constant 0 : index
    %c0_6 = arith.constant 0 : index
    %7 = vector.load %arg5[%c0_5, %c0_6] : memref<8x128xf32, #tpu.memory_space<vmem>>, vector<8x128xf32>
    tpu.vector_store %arg5[%c0_5, %c0_6], %6 {strides = array<i32>} : memref<8x128xf32, #tpu.memory_space<vmem>>, vector<8x128xf32>,
    return
  }
  func.func @transform_0(%arg0: i32, %arg1: i32) -> (i32, i32) {
    %c0_i32 = arith.constant 0 : i32
    return %arg0, %arg1 : i32, i32
  }
  func.func @transform_1(%arg0: i32, %arg1: i32) -> (i32, i32) {
    %c0_i32 = arith.constant 0 : i32
    %c0_i32_0 = arith.constant 0 : i32
    return %arg0, %c0_i32 : i32, i32
  }
  func.func @transform_2(%arg0: i32, %arg1: i32) -> (i32, i32) {
    %c0_i32 = arith.constant 0 : i32
    %c0_i32_0 = arith.constant 0 : i32
    return %arg0, %c0_i32 : i32, i32
  }
  func.func @transform_3(%arg0: i32, %arg1: i32) -> (i32, i32) {
    %c0_i32 = arith.constant 0 : i32
    return %arg0, %arg1 : i32, i32
  }
}

</mosaic_0001>

<bundles_post_ra>
// kernel: tpu_custom_call.1
= control target key start
LH: loop header
LB: loop body
LE: loop exit
PB: predicated region body
PF: predicated region fallthrough
CT: control target
= control target key end

     0   :  { %8 = vsyncpa [#allocation3], 0  ;;  %s640_s0 = inlined_call_operand.vmem [shape: f32[8,256], index: 0, kind: input, shape index: {}]   ;;  %s641_s1 = inlined_call_operand.vmem [shape: f32[8,1], index: 1, kind: input, shape index: {}]   ;;  %s642_s2 = inlined_call_operand.vmem [shape: f32[8,1], index: 2, kind: input, shape index: {}]   ;;  %s643_s3 = inlined_call_operand.hbm [shape: f32[8,256], index: 3, kind: output, shape index: {}]  }
   0x1   :  { %10 = vsyncpa [#allocation3 + $0x1], 0  ;;  %s535_s12 = smov 0   ;;  %s537_s13 = smov 0  }
   0x2   :  { %s539_s14 = smov 0   ;;  %s541_s15 = smov 0  }
   0x3   :  { %s543_s16 = smov 0   ;;  %s545_s17 = smov 0  }
   0x4 LB: > { %s365_s18 = sadd.s32 4294967295, %s511_s17   ;;  %s366_s19 = sadd.s32 4294967294, %s511_s17   ;;  %s511_s17 = sphi %s545_s17, %s16_s17   ;;  %s507_s16 = sphi %s543_s16, %s650_s16   ;;  %s503_s15 = sphi %s541_s15, %s649_s15   ;;  %s499_s14 = sphi %s539_s14, %s648_s14   ;;  %s495_s13 = sphi %s537_s13, %s647_s13   ;;  %s491_s12 = sphi %s535_s12, %s646_s12  }
   0x5   : > { %s25_s20 = sadd.s32 1, %s507_s16  ;;  %s117_s21 = sadd.s32 1, %s499_s14 }
   0x6   : > { %p26_p0 = scmp.ge.s32.totalorder %s25_s20, 2  ;;  %p127_p1 = scmp.ne.s32.totalorder %s499_s14, %s495_s13 }
   0x7   : > { %p128_p2 = scmp.eq.s32.totalorder %s365_s18, 1  ;;  %p133_p3 = scmp.ne.s32.totalorder %s495_s13, %s491_s12 }
   0x8   : > { %s652_s20 = smov (%p26_p0, %s25_s20), 0  ;;  %p134_p5 = scmp.eq.s32.totalorder %s366_s19, 1 }
   0x9   : > { %p575_p4 = por %p128_p2, %p127_p1  ;;  %s113_s23 = ssub.s32 %s507_s16, %s652_s20 }
   0xa   : > { %p371_p6 = scmp.ge.s32.totalorder %s511_s17, 1  ;;  %p115_p7 = scmp.eq.s32.totalorder %s113_s23, 0 }
   0xb   : > { %p582_p8 = por %p134_p5, %p133_p3  ;;  %p177_p9 = scmp.lt.s32.totalorder %s511_s17, 3 }
   0xc   : > { %s588_s25 = scalar_select %p115_p7, %s499_s14, %s117_s21  }
   0xd   : > { %p178_p10 = pnand %p371_p6, %p177_p9 }
   0xe   : > { %p214_p11 = scmp.lt.s32.totalorder (!%p178_p10), %s503_s15, 1  ;;  %s209_s4 = sand.u32 (!%p178_p10), 1, %s495_s13  }
   0xf   : > { %181 = sbr.rel (%p178_p10) target bundleno = 165 (0xa5), region = 32  ;;  %s372_s6 = sshll.u32 (!%p178_p10), %s209_s4, 3 }
  0x10   : > { %s375_s10 = sshll.u32 (!%p178_p10), %s503_s15, 7  ;;  %s211_s11 = scalar_lea.vmem (!%p178_p10), [#allocation2], %s372_s6 }
  0x11   : > { %s260_s18 = sshll.u32 (!%p178_p10), %s211_s11, 4  ;;  %s258_s23 = scalar_lea.hbm (!%p178_p10), %s643_s3, %s375_s10  ;;  %s261_s18 = int_to_ptr.vmem [resolvable:$true] %s260_s18 }
  0x12   : > { %s245_s26 = scalar_lea.sflag (!%p178_p10), [#allocation3], %s209_s4  ;;  %s435_s27 = scalar_lea.vmem (!%p178_p10), %s261_s18, 128 }
  0x13   : > { %p436_p12 = scmp.ne.s32.totalorder (!%p178_p10), %s261_s18, %s435_s27  ;;  %s514_s28 = smov (!%p178_p10), [#allocation2]  }
  0x14   : > { %v229_v0 = vld [vmem:[%s641_s1] sm:$0xff]  ;;  %v513_v1 = vmov 0   ;;  %s215_s30 = scalar_select %p214_p11, %s503_s15, 1 }
  0x15   : > { %434 = vset.pattern.permute.xlu0 %v513_v1  ;;  %v236_v2 = vld [vmem:[%s642_s2] sm:$0xff]  ;;  %p437_p13 = pnand %p436_p12, %p575_p4  ;;  %s439_s29 = sshll.u32 %s514_s28, 4  ;;  %s440_s29 = int_to_ptr.vmem [resolvable:$false] %s439_s29 }
  0x16   : > { %232 = vperm.xlu0 %434, %v229_v0   ;;  %s373_s5 = sshll.u32 %s215_s30, 3  ;;  %s441_s15 = scalar_lea.vmem %s440_s29, 256 }
  0x17   : > { %s219_s9 = scalar_lea.vmem %s640_s0, %s373_s5  ;;  %p438_p0 = pneg %p437_p13 }
  0x18   : > { %v228_v4 = vld [vmem:[%s219_s9] sm:$0xff]  ;;  %p442_p1 = scmp.lt.s32.totalorder %s261_s18, %s440_s29  ;;  %p443_p2 = scmp.lt.s32.totalorder %s441_s15, %s435_s27 }
  0x1a   : > { %239 = vperm.xlu0 %434, %v236_v2   ;;  %p444_p3 = por %p443_p2, %p442_p1 }
  0x1c   : > { %p445_p5 = pnand %p444_p3, %p438_p0 }
  0x91   : > { %v233_v3 = vpop.permute.xlu0 %232 }
  0x92   : > { %v235_v5 = vmul.f32 %v233_v3, %v228_v4 }
  0x95   : > { %v240_v6 = vpop.permute.xlu0 %239 }
  0x96   : > { %v242_v7 = vadd.f32 %v240_v6, %v235_v5 }
  0x98   : > { %243 = vst [vmem:[%s211_s11] sm:$0xff] %v242_v7 }
  0x99   : > { %448 = shalt.err (!%p445_p5)
}
  0x9a   : > { %s449_s30 = scalar_lea.hbm %s258_s23, 128  ;;  %s453_s6 = scalar_lea.hbm %s643_s3, 256 }
  0x9b   : > { %p450_p6 = scmp.ne.s32.totalorder %s258_s23, %s449_s30  ;;  %p454_p10 = scmp.lt.s32.totalorder %s258_s23, %s643_s3 }
  0x9c   : > { %p455_p11 = scmp.lt.s32.totalorder %s453_s6, %s449_s30 }
  0x9d   : > { %p451_p7 = pnand %p450_p6, %p575_p4 }
  0x9e   : > { %p456_p12 = por %p455_p11, %p454_p10 }
  0x9f   : > { %p452_p9 = pneg %p451_p7 }
  0xa1   : > { %p457_p13 = pnand %p456_p12, %p452_p9 }
  0xa3   : > { %460 = shalt.err (!%p457_p13)
}
  0xa4   : > { %378 = dma.vmem_to_hbm [thread:$0]  (%p575_p4), %s261_s18, 128, %s258_s23, %s245_s26  }
  0xa5 PF: > { %p384_p0 = scmp.ge.s32.totalorder %s511_s17, 2  ;;  %s272_s9 = sand.u32 1, %s491_s12  }
  0xa6   : > { %s273_s10 = scalar_lea.sflag [#allocation3], %s272_s9 }
  0xa7   : > { %p381_p1 = pnand %p384_p0, %p582_p8 }
  0xa9   : > { %p382_p2 = pneg %p381_p1 }
  0xab   : > { %486 = dma.done.wait (%p382_p2), %s273_s10, 128  }
  0xac   : > { %488 = vsyncadd (%p382_p2), %s273_s10, 4294967168  ;;  %s16_s17 = sadd.s32 1, %s511_s17   ;;  %s646_s12 = smov %s495_s13 }
  0xad   : > { %p13_p3 = scmp.ge.s32.totalorder %s16_s17, 4   ;;  %s647_s13 = smov %s499_s14 }
  0xae   : > { %s648_s14 = smov %s588_s25  ;;  %s649_s15 = smov %s507_s16 }
  0xaf   : > { %s650_s16 = smov %s652_s20  ;;  %15 = sbr.rel (!%p13_p3) target bundleno = 4 (0x4), region = 73 }
  0xb4   :  { %278 = vsyncpa [#allocation3], 1 }
  0xb5   :  { %280 = vsyncpa [#allocation3 + $0x1], 1 }

</bundles_post_ra>
